<compile_context>
chip_gen: v6e
topology: v6e:2x2x1
jax: 0.10.0
libtpu: 0.0.40
codegen_flags: <defaults>
</compile_context>

<pallas_src>
import functools

import jax
import jax.numpy as jnp
from jax.experimental import pallas as pl
from jax.experimental.pallas import tpu as pltpu

_LANES = 128


def _hinton_kernel(s_ref, t_ref, tgt_ref, acc_ref, *,
                   inv_temp, ignore_label, w_classify, w_distill,
                   pixels_per_batch, row_tile, tiles_per_split, needs_mask):
    """One grid step: accumulate per-pixel CE / KD partial sums for one row-tile.

    s_ref, t_ref : (1, C, RT, 128)          student / teacher logits
    tgt_ref      : (1, RT, 128)             int32 hard labels
    acc_ref      : (1, n_planes, RT, 128)   float32 resident accumulator
    """
    split = pl.program_id(1)
    i = pl.program_id(2)

    @pl.when(i == 0)
    def _init():
        acc_ref[...] = jnp.zeros_like(acc_ref)

    s = s_ref[0].astype(jnp.float32)        # (C, RT, 128)
    t = t_ref[0].astype(jnp.float32)        # (C, RT, 128)
    tgt = tgt_ref[0]                        # (RT, 128) int32

    # Channel reductions run over the leading (untiled) axis: dense VPU ops on
    # fully packed (RT, 128) slabs, no cross-sublane XLU work, no empty sublanes.
    m = jnp.max(s, axis=0)                                        # (RT, 128)
    d = s - m[None]                                               # (C, RT, 128)
    lse = m + jnp.log(jnp.sum(jnp.exp(d), axis=0))                # (RT, 128)

    # Hard-label CE: gather s[target] via a leading-axis iota select (NaN-safe).
    ch = jax.lax.broadcasted_iota(jnp.int32, s.shape, 0)          # (C, RT, 128)
    s_tgt = jnp.sum(jnp.where(ch == tgt[None], s, 0.0), axis=0)   # (RT, 128)
    pix_ce = lse - s_tgt

    # Soft-target KD CE, reusing the student max/diff for the tempered logsumexp:
    #   lse_T(s) = m/T + log(sum exp((s - m)/T))       (valid since 1/T > 0)
    #   pix_kd   = lse_T(s) - (1/T) * (sum e_t * s) / (sum e_t)
    lse_s = m * inv_temp + jnp.log(jnp.sum(jnp.exp(d * inv_temp), axis=0))
    mt = jnp.max(t, axis=0)
    e_t = jnp.exp((t - mt[None]) * inv_temp)
    denom = jnp.sum(e_t, axis=0)
    num = jnp.sum(e_t * s, axis=0)
    # EUP reciprocal + one Newton refinement instead of an f32 VALU divide.
    r = pl.reciprocal(denom, approx=True)
    r = r * (2.0 - denom * r)
    pix_kd = lse_s - inv_temp * num * r

    if needs_mask:
        # Only built when the pixel count does not fill whole tiles (padded lanes
        # hold zero logits; the where-SELECT keeps them out of the sums).
        base = (split * tiles_per_split + i) * row_tile * _LANES
        ridx = jax.lax.broadcasted_iota(jnp.int32, (row_tile, _LANES), 0)
        lidx = jax.lax.broadcasted_iota(jnp.int32, (row_tile, _LANES), 1)
        in_bounds = (base + ridx * _LANES + lidx) < pixels_per_batch
    else:
        in_bounds = None

    if ignore_label is None:
        # Fast path: both loss terms share the same denominator (total pixels),
        # so pre-weight and accumulate a single dense plane.
        contrib = w_classify * pix_ce + w_distill * pix_kd
        if in_bounds is not None:
            contrib = jnp.where(in_bounds, contrib, 0.0)
        acc_ref[0, 0] += contrib
    else:
        valid = tgt != ignore_label
        if in_bounds is not None:
            valid = valid & in_bounds
            pix_kd = jnp.where(in_bounds, pix_kd, 0.0)
        ce_c = jnp.where(valid, pix_ce, 0.0)
        validf = valid.astype(jnp.float32)
        # Single stacked RMW instead of three separate accumulator updates.
        acc_ref[0] += jnp.stack([ce_c, validf, pix_kd], axis=0)


def _pick_row_tile(rows, C, n_planes):
    """Rows (of 128 pixels) per grid step, sized from a VMEM budget."""
    # Bytes per 128-pixel row: double-buffered student + teacher + target blocks,
    # plus the resident accumulator (counted twice for headroom).
    per_row = 4 * _LANES * (2 * (2 * C + 1) + 2 * n_planes)
    budget = 10 * (1 << 20)   # ~10 MiB of pipeline buffers: fits v5e's 16 MiB scoped default
    max_rt = int(min(2048, max(8, budget // per_row)))
    if rows <= max_rt:
        return rows           # single full-extent tile (no (8,128) divisibility needed)
    rt = (max_rt // 8) * 8
    best = rt
    while rt >= 8:            # prefer a divisor of `rows` -> no padding / per-step masking
        if rows % rt == 0:
            return rt
        rt -= 8
    return best


def hinton_distillation_loss(
    student_output,      # (B, C, Z, Y, X) float logits
    teacher_output,      # (B, C, Z, Y, X) float logits
    target,              # (B, 1, Z, Y, X) int labels
    *,
    temperature_index: float,
    weight_of_distill: float,
    ignore_label=None,
    row_tile=None,       # rows of 128 pixels per grid step; auto-chosen if None
):
    B, C, Z, Y, X = student_output.shape
    assert target.shape == (B, 1, Z, Y, X)
    ppb = Z * Y * X
    total_pixels = B * ppb

    n_planes = 1 if ignore_label is None else 3
    rows = -(-ppb // _LANES)
    if row_tile is None:
        row_tile = _pick_row_tile(rows, C, n_planes)
    row_tile = int(row_tile)
    n_tiles = -(-rows // row_tile)
    rows_pad = n_tiles * row_tile
    ppb_pad = rows_pad * _LANES
    needs_mask = ppb_pad != ppb

    # Megacore pixel split (v7x): give both TensorCores work even when B == 1.
    n_splits = 2 if (B == 1 and n_tiles >= 2 and n_tiles % 2 == 0) else 1
    tps = n_tiles // n_splits

    # Free row-major views: pixels land on (sublane, lane) = (rows, 128) so every
    # per-pixel quantity in the kernel is a fully dense vreg slab.
    s3 = student_output.reshape(B, C, ppb)
    t3 = teacher_output.reshape(B, C, ppb)
    tgt3 = target.reshape(B, ppb)
    if tgt3.dtype != jnp.int32:
        tgt3 = tgt3.astype(jnp.int32)
    if needs_mask:
        pad = ppb_pad - ppb
        s3 = jnp.pad(s3, ((0, 0), (0, 0), (0, pad)))
        t3 = jnp.pad(t3, ((0, 0), (0, 0), (0, pad)))
        tgt3 = jnp.pad(tgt3, ((0, 0), (0, pad)))
    s4 = s3.reshape(B, C, rows_pad, _LANES)
    t4 = t3.reshape(B, C, rows_pad, _LANES)
    tgt4 = tgt3.reshape(B, rows_pad, _LANES)

    kernel = functools.partial(
        _hinton_kernel,
        inv_temp=float(1.0 / temperature_index),
        ignore_label=None if ignore_label is None else int(ignore_label),
        w_classify=float(1.0 - weight_of_distill),
        w_distill=float(weight_of_distill * temperature_index * temperature_index),
        pixels_per_batch=int(ppb),
        row_tile=row_tile,
        tiles_per_split=int(tps),
        needs_mask=bool(needs_mask),
    )

    partials = pl.pallas_call(
        kernel,
        out_shape=jax.ShapeDtypeStruct((B * n_splits, n_planes, row_tile, _LANES),
                                       jnp.float32),
        grid_spec=pltpu.PrefetchScalarGridSpec(
            num_scalar_prefetch=0,
            grid=(B, n_splits, tps),
            in_specs=[
                pl.BlockSpec((1, C, row_tile, _LANES),
                             lambda b, s, i: (b, 0, s * tps + i, 0)),
                pl.BlockSpec((1, C, row_tile, _LANES),
                             lambda b, s, i: (b, 0, s * tps + i, 0)),
                pl.BlockSpec((1, row_tile, _LANES),
                             lambda b, s, i: (b, s * tps + i, 0)),
            ],
            out_specs=pl.BlockSpec((1, n_planes, row_tile, _LANES),
                                   lambda b, s, i: (b * n_splits + s, 0, 0, 0)),
        ),
        compiler_params=pltpu.CompilerParams(
            dimension_semantics=("parallel", "parallel", "arbitrary"),
        ),
    )(s4, t4, tgt4)

    totals = jnp.sum(partials, axis=(0, 2, 3))      # (n_planes,)

    if ignore_label is None:
        # Plane 0 already carries (1-w_d)*CE + w_d*T^2*KD per pixel; both terms
        # are means over ALL pixels.
        return totals[0] / jnp.float32(total_pixels)

    # Plane 0 = sum of hard-label CE over valid pixels, plane 1 = valid count,
    # plane 2 = sum of KD CE over all pixels (PyTorch ignores ignore_index for
    # probability targets).  NOTE: n_valid == 0 yields NaN, matching PyTorch.
    student_loss = totals[0] / totals[1]
    distill_loss = totals[2] / jnp.float32(total_pixels)
    w_d = jnp.float32(weight_of_distill)
    w_c = jnp.float32(1.0 - weight_of_distill)
    grad_comp = jnp.float32(temperature_index * temperature_index)
    return w_c * student_loss + w_d * grad_comp * distill_loss


def _reference_loss(student, teacher, target, T, w_d, ignore_label=None):
    """Pure-JAX reference matching the PyTorch forward (for verification)."""
    B, C = student.shape[:2]
    s = student.reshape(B, C, -1).astype(jnp.float32)
    t = teacher.reshape(B, C, -1).astype(jnp.float32)
    y = target[:, 0].reshape(B, -1).astype(jnp.int32)

    logp = jax.nn.log_softmax(s, axis=1)
    nll = -jnp.take_along_axis(logp, y[:, None, :], axis=1)[:, 0, :]
    if ignore_label is not None:
        valid = (y != ignore_label).astype(jnp.float32)
        student_loss = jnp.sum(nll * valid) / jnp.sum(valid)
    else:
        student_loss = jnp.mean(nll)

    p_t = jax.nn.softmax(t / T, axis=1)
    logp_s = jax.nn.log_softmax(s / T, axis=1)
    distill_loss = jnp.mean(-jnp.sum(p_t * logp_s, axis=1))

    return (1.0 - w_d) * student_loss + w_d * (T * T) * distill_loss


if __name__ == "__main__":
    # Module hyper-parameters (deterministic, set in-script).
    temperature_index = 2.0
    weight_of_distill = 0.7

    # Small 3-D segmentation shapes: (B, C, Z, Y, X), target has C=1.
    B, C, Z, Y, X = 2, 4, 2, 8, 16
    key = jax.random.PRNGKey(0)
    k1, k2, k3 = jax.random.split(key, 3)
    student = jax.random.normal(k1, (B, C, Z, Y, X), dtype=jnp.float32)
    teacher = jax.random.normal(k2, (B, C, Z, Y, X), dtype=jnp.float32)
    target = jax.random.randint(k3, (B, 1, Z, Y, X), 0, C, dtype=jnp.int32)

    # Fast path: no ignore_label (single pre-weighted accumulator plane).
    loss = hinton_distillation_loss(
        student, teacher, target,
        temperature_index=temperature_index,
        weight_of_distill=weight_of_distill,
        ignore_label=None,
    )
    loss = jax.block_until_ready(loss)
    ref = _reference_loss(student, teacher, target,
                          temperature_index, weight_of_distill, None)
    assert jnp.allclose(loss, ref, rtol=2e-5, atol=2e-5), (loss, ref)

    # ignore_label path (3-plane accumulator).
    loss_i = hinton_distillation_loss(
        student, teacher, target,
        temperature_index=temperature_index,
        weight_of_distill=weight_of_distill,
        ignore_label=0,
    )
    loss_i = jax.block_until_ready(loss_i)
    ref_i = _reference_loss(student, teacher, target,
                            temperature_index, weight_of_distill, 0)
    assert jnp.allclose(loss_i, ref_i, rtol=2e-5, atol=2e-5), (loss_i, ref_i)

    print("KERNEL_OK")
</pallas_src>

<mosaic_0001>
module attributes {stable_mosaic.version = 11 : i64} {
  func.func @_hinton_kernel(%arg0: i32, %arg1: i32, %arg2: i32, %arg3: memref<1x4x2x128xf32, #tpu.memory_space<vmem>>, %arg4: memref<1x4x2x128xf32, #tpu.memory_space<vmem>>, %arg5: memref<1x2x128xi32, #tpu.memory_space<vmem>>, %arg6: memref<1x1x2x128xf32, #tpu.memory_space<vmem>>) attributes {dimension_semantics = [#tpu.dimension_semantics<parallel>, #tpu.dimension_semantics<parallel>, #tpu.dimension_semantics<arbitrary>], iteration_bounds = array<i64: 2, 1, 1>, scalar_prefetch = 0 : i64, scratch_operands = 0 : i64, tpu.core_type = #tpu.core_type<tc>, window_params = [{transform_indices = @transform_0, window_bounds = array<i64: 1, 4, 2, 128>}, {transform_indices = @transform_1, window_bounds = array<i64: 1, 4, 2, 128>}, {transform_indices = @transform_2, window_bounds = array<i64: 1, 2, 128>}, {transform_indices = @transform_3, window_bounds = array<i64: 1, 1, 2, 128>}]} {
    %c0_i32 = arith.constant 0 : i32
    %0 = arith.cmpi eq, %arg2, %c0_i32 : i32
    %1 = arith.extui %0 : i1 to i32
    %c0_i32_0 = arith.constant 0 : i32
    %2 = arith.cmpi ne, %1, %c0_i32_0 : i32
    scf.if %2 {
      %cst_33 = arith.constant 0.000000e+00 : f32
      %63 = vector.broadcast %cst_33 : f32 to vector<1x1x2x128xf32>
      %c0_34 = arith.constant 0 : index
      %c0_35 = arith.constant 0 : index
      %c0_36 = arith.constant 0 : index
      %c0_37 = arith.constant 0 : index
      %64 = vector.load %arg6[%c0_34, %c0_35, %c0_36, %c0_37] : memref<1x1x2x128xf32, #tpu.memory_space<vmem>>, vector<1x1x2x128xf32>
      tpu.vector_store %arg6[%c0_34, %c0_35, %c0_36, %c0_37], %63 {strides = array<i32>} : memref<1x1x2x128xf32, #tpu.memory_space<vmem>>, vector<1x1x2x128xf32>,
    } else {
    }
    %c0 = arith.constant 0 : index
    %c0_1 = arith.constant 0 : index
    %c0_2 = arith.constant 0 : index
    %c0_3 = arith.constant 0 : index
    %3 = vector.load %arg3[%c0, %c0_1, %c0_2, %c0_3] : memref<1x4x2x128xf32, #tpu.memory_space<vmem>>, vector<1x4x2x128xf32>
    %4 = vector.shape_cast %3 : vector<1x4x2x128xf32> to vector<4x2x128xf32>
    %c0_4 = arith.constant 0 : index
    %c0_5 = arith.constant 0 : index
    %c0_6 = arith.constant 0 : index
    %c0_7 = arith.constant 0 : index
    %5 = vector.load %arg4[%c0_4, %c0_5, %c0_6, %c0_7] : memref<1x4x2x128xf32, #tpu.memory_space<vmem>>, vector<1x4x2x128xf32>
    %6 = vector.shape_cast %5 : vector<1x4x2x128xf32> to vector<4x2x128xf32>
    %c0_8 = arith.constant 0 : index
    %c0_9 = arith.constant 0 : index
    %c0_10 = arith.constant 0 : index
    %7 = vector.load %arg5[%c0_8, %c0_9, %c0_10] : memref<1x2x128xi32, #tpu.memory_space<vmem>>, vector<1x2x128xi32>
    %8 = vector.shape_cast %7 : vector<1x2x128xi32> to vector<2x128xi32>
    %cst = arith.constant dense<0xFF800000> : vector<2x128xf32>
    %9 = vector.multi_reduction <maximumf>, %4, %cst [0] : vector<4x2x128xf32> to vector<2x128xf32>
    %10 = vector.shape_cast %9 : vector<2x128xf32> to vector<1x2x128xf32>
    %11 = vector.broadcast %10 : vector<1x2x128xf32> to vector<4x2x128xf32>
    %12 = arith.subf %4, %11 : vector<4x2x128xf32>
    %13 = math.exp %12 : vector<4x2x128xf32>
    %cst_11 = arith.constant dense<0.000000e+00> : vector<2x128xf32>
    %14 = vector.multi_reduction <add>, %13, %cst_11 [0] : vector<4x2x128xf32> to vector<2x128xf32>
    %15 = math.log %14 : vector<2x128xf32>
    %16 = arith.addf %9, %15 : vector<2x128xf32>
    %17 = tpu.iota {dimensions = array<i32: 0>} : vector<4x2x128xi32>
    %18 = vector.shape_cast %8 : vector<2x128xi32> to vector<1x2x128xi32>
    %19 = vector.broadcast %18 : vector<1x2x128xi32> to vector<4x2x128xi32>
    %20 = arith.cmpi eq, %17, %19 : vector<4x2x128xi32>
    %cst_12 = arith.constant 0.000000e+00 : f32
    %21 = vector.broadcast %cst_12 : f32 to vector<4x2x128xf32>
    %22 = arith.select %20, %4, %21 : vector<4x2x128xi1>, vector<4x2x128xf32>
    %cst_13 = arith.constant dense<0.000000e+00> : vector<2x128xf32>
    %23 = vector.multi_reduction <add>, %22, %cst_13 [0] : vector<4x2x128xf32> to vector<2x128xf32>
    %24 = arith.subf %16, %23 : vector<2x128xf32>
    %cst_14 = arith.constant 5.000000e-01 : f32
    %25 = vector.broadcast %cst_14 : f32 to vector<2x128xf32>
    %26 = arith.mulf %9, %25 : vector<2x128xf32>
    %cst_15 = arith.constant 5.000000e-01 : f32
    %27 = vector.broadcast %cst_15 : f32 to vector<4x2x128xf32>
    %28 = arith.mulf %12, %27 : vector<4x2x128xf32>
    %29 = math.exp %28 : vector<4x2x128xf32>
    %cst_16 = arith.constant dense<0.000000e+00> : vector<2x128xf32>
    %30 = vector.multi_reduction <add>, %29, %cst_16 [0] : vector<4x2x128xf32> to vector<2x128xf32>
    %31 = math.log %30 : vector<2x128xf32>
    %32 = arith.addf %26, %31 : vector<2x128xf32>
    %cst_17 = arith.constant dense<0xFF800000> : vector<2x128xf32>
    %33 = vector.multi_reduction <maximumf>, %6, %cst_17 [0] : vector<4x2x128xf32> to vector<2x128xf32>
    %34 = vector.shape_cast %33 : vector<2x128xf32> to vector<1x2x128xf32>
    %35 = vector.broadcast %34 : vector<1x2x128xf32> to vector<4x2x128xf32>
    %36 = arith.subf %6, %35 : vector<4x2x128xf32>
    %cst_18 = arith.constant 5.000000e-01 : f32
    %37 = vector.broadcast %cst_18 : f32 to vector<4x2x128xf32>
    %38 = arith.mulf %36, %37 : vector<4x2x128xf32>
    %39 = math.exp %38 : vector<4x2x128xf32>
    %cst_19 = arith.constant dense<0.000000e+00> : vector<2x128xf32>
    %40 = vector.multi_reduction <add>, %39, %cst_19 [0] : vector<4x2x128xf32> to vector<2x128xf32>
    %41 = arith.mulf %39, %4 : vector<4x2x128xf32>
    %cst_20 = arith.constant dense<0.000000e+00> : vector<2x128xf32>
    %42 = vector.multi_reduction <add>, %41, %cst_20 [0] : vector<4x2x128xf32> to vector<2x128xf32>
    %43 = tpu.reciprocal %40 {approx = true} : vector<2x128xf32> -> vector<2x128xf32>
    %44 = arith.mulf %40, %43 : vector<2x128xf32>
    %cst_21 = arith.constant 2.000000e+00 : f32
    %45 = vector.broadcast %cst_21 : f32 to vector<2x128xf32>
    %46 = arith.subf %45, %44 : vector<2x128xf32>
    %47 = arith.mulf %43, %46 : vector<2x128xf32>
    %cst_22 = arith.constant 5.000000e-01 : f32
    %48 = vector.broadcast %cst_22 : f32 to vector<2x128xf32>
    %49 = arith.mulf %48, %42 : vector<2x128xf32>
    %50 = arith.mulf %49, %47 : vector<2x128xf32>
    %51 = arith.subf %32, %50 : vector<2x128xf32>
    %cst_23 = arith.constant 3.000000e-01 : f32
    %52 = vector.broadcast %cst_23 : f32 to vector<2x128xf32>
    %53 = arith.mulf %52, %24 : vector<2x128xf32>
    %cst_24 = arith.constant 2.800000e+00 : f32
    %54 = vector.broadcast %cst_24 : f32 to vector<2x128xf32>
    %55 = arith.mulf %54, %51 : vector<2x128xf32>
    %56 = arith.addf %53, %55 : vector<2x128xf32>
    %c0_25 = arith.constant 0 : index
    %c0_26 = arith.constant 0 : index
    %c0_27 = arith.constant 0 : index
    %c0_28 = arith.constant 0 : index
    %57 = vector.load %arg6[%c0_25, %c0_26, %c0_27, %c0_28] : memref<1x1x2x128xf32, #tpu.memory_space<vmem>>, vector<1x1x2x128xf32>
    %58 = vector.shape_cast %57 : vector<1x1x2x128xf32> to vector<2x128xf32>
    %59 = arith.addf %58, %56 : vector<2x128xf32>
    %c0_29 = arith.constant 0 : index
    %c0_30 = arith.constant 0 : index
    %c0_31 = arith.constant 0 : index
    %c0_32 = arith.constant 0 : index
    %60 = vector.load %arg6[%c0_29, %c0_30, %c0_31, %c0_32] : memref<1x1x2x128xf32, #tpu.memory_space<vmem>>, vector<1x1x2x128xf32>
    %61 = vector.shape_cast %60 : vector<1x1x2x128xf32> to vector<2x128xf32>
    %62 = vector.shape_cast %59 : vector<2x128xf32> to vector<1x1x2x128xf32>
    tpu.vector_store %arg6[%c0_29, %c0_30, %c0_31, %c0_32], %62 {strides = array<i32>} : memref<1x1x2x128xf32, #tpu.memory_space<vmem>>, vector<1x1x2x128xf32>,
    return
  }
  func.func @transform_0(%arg0: i32, %arg1: i32, %arg2: i32) -> (i32, i32, i32, i32) {
    %c1_i32 = arith.constant 1 : i32
    %0 = arith.muli %arg1, %c1_i32 : i32
    %1 = arith.addi %0, %arg2 : i32
    %c0_i32 = arith.constant 0 : i32
    %c0_i32_0 = arith.constant 0 : i32
    %c0_i32_1 = arith.constant 0 : i32
    return %arg0, %c0_i32, %1, %c0_i32_0 : i32, i32, i32, i32
  }
  func.func @transform_1(%arg0: i32, %arg1: i32, %arg2: i32) -> (i32, i32, i32, i32) {
    %c1_i32 = arith.constant 1 : i32
    %0 = arith.muli %arg1, %c1_i32 : i32
    %1 = arith.addi %0, %arg2 : i32
    %c0_i32 = arith.constant 0 : i32
    %c0_i32_0 = arith.constant 0 : i32
    %c0_i32_1 = arith.constant 0 : i32
    return %arg0, %c0_i32, %1, %c0_i32_0 : i32, i32, i32, i32
  }
  func.func @transform_2(%arg0: i32, %arg1: i32, %arg2: i32) -> (i32, i32, i32) {
    %c1_i32 = arith.constant 1 : i32
    %0 = arith.muli %arg1, %c1_i32 : i32
    %1 = arith.addi %0, %arg2 : i32
    %c0_i32 = arith.constant 0 : i32
    %c0_i32_0 = arith.constant 0 : i32
    return %arg0, %1, %c0_i32 : i32, i32, i32
  }
  func.func @transform_3(%arg0: i32, %arg1: i32, %arg2: i32) -> (i32, i32, i32, i32) {
    %c1_i32 = arith.constant 1 : i32
    %0 = arith.muli %arg0, %c1_i32 : i32
    %1 = arith.addi %0, %arg1 : i32
    %c0_i32 = arith.constant 0 : i32
    %c0_i32_0 = arith.constant 0 : i32
    %c0_i32_1 = arith.constant 0 : i32
    %c0_i32_2 = arith.constant 0 : i32
    return %1, %c0_i32, %c0_i32_0, %c0_i32_1 : i32, i32, i32, i32
  }
}

</mosaic_0001>

<bundles_post_ra>
// kernel: tpu_custom_call.1
= control target key start
LH: loop header
LB: loop body
LE: loop exit
PB: predicated region body
PF: predicated region fallthrough
CT: control target
= control target key end

     0   :  { %s1174_s0 = inlined_call_operand.hbm [shape: f32[2,4,2,128], index: 0, kind: input, shape index: {}]   ;;  %s1175_s1 = inlined_call_operand.hbm [shape: f32[2,4,2,128], index: 1, kind: input, shape index: {}]   ;;  %s1176_s2 = inlined_call_operand.hbm [shape: s32[2,2,128], index: 2, kind: input, shape index: {}]   ;;  %s1177_s3 = inlined_call_operand.hbm [shape: f32[2,1,2,128], index: 3, kind: output, shape index: {}]  }
   0x1   :  { %1180 = sst [smem:[#allocation15_spill]] %s1175_s1 }
   0x2   :  { %8 = vsyncpa [#allocation3], 0 }
   0x3   :  { %10 = vsyncpa [#allocation3 + $0x1], 0 }
   0x4   :  { %11 = vsyncpa [#allocation6], 0 }
   0x5   :  { %13 = vsyncpa [#allocation6 + $0x1], 0 }
   0x6   :  { %14 = vsyncpa [#allocation4], 0 }
   0x7   :  { %16 = vsyncpa [#allocation4 + $0x1], 0  ;;  %s916_s12 = smov 0   ;;  %s918_s13 = smov 0  }
   0x8   :  { %s920_s14 = smov 0   ;;  %s922_s15 = smov 0  }
   0x9   :  { %s924_s16 = smov 0   ;;  %s926_s17 = smov 0  }
   0xa LB: > { %1181 = sst [smem:[#allocation12_spill]] %s875_s14  ;;  %s947_s18 = sadd.s32 4294967295, %s887_s17   ;;  %s887_s17 = sphi %s926_s17, %s22_s17   ;;  %s883_s16 = sphi %s924_s16, %s1198_s16   ;;  %s879_s15 = sphi %s922_s15, %s1197_s15   ;;  %s875_s14 = sphi %s920_s14, %s1193_s14   ;;  %s871_s13 = sphi %s918_s13, %s1196_s13   ;;  %s867_s12 = sphi %s916_s12, %s1195_s12  }
   0xb   : > { %s592_s19 = sadd.s32 4294967294, %s887_s17   ;;  %s41_s20 = sadd.s32 1, %s883_s16 }
   0xc   : > { %s52_s21 = sadd.s32 1, %s875_s14  ;;  %p43_p0 = scmp.ge.s32.totalorder %s41_s20, 2 }
   0xd   : > { %p59_p1 = scmp.ne.s32.totalorder %s875_s14, %s871_s13  ;;  %p60_p2 = scmp.eq.s32.totalorder %s887_s17, 0 }
   0xe   : > { %p65_p3 = scmp.ne.s32.totalorder %s871_s13, %s867_s12  ;;  %s1200_s20 = smov (%p43_p0, %s41_s20), 0 }
   0xf   : > { %1182 = sst [smem:[#allocation13_spill]] %s1200_s20  ;;  %p959_p4 = por %p60_p2, %p59_p1 }
  0x10   : > { %p66_p5 = scmp.eq.s32.totalorder %s947_s18, 0  ;;  %s47_s23 = ssub.s32 %s883_s16, %s1200_s20 }
  0x11   : > { %p151_p6 = scmp.eq.s32.totalorder %s947_s18, 1  ;;  %p50_p7 = scmp.eq.s32.totalorder %s47_s23, 0 }
  0x12   : > { %p967_p8 = por %p66_p5, %p65_p3  ;;  %p157_p10 = scmp.eq.s32.totalorder %s592_s19, 1 }
  0x13   : > { %p971_p9 = por %p151_p6, %p59_p1  ;;  %p636_p13 = scmp.lt.s32.totalorder %s887_s17, 2 }
  0x14   : > { %s976_s26 = scalar_select %p50_p7, %s875_s14, %s52_s21  }
  0x15   : > { %p978_p11 = por %p157_p10, %p65_p3  ;;  %s985_s28 = sand.u32 1, %s875_s14  }
  0x16   : > { %1186 = sst [smem:[#allocation14_spill]] %s976_s26  ;;  %s595_s29 = sshll.u32 %s985_s28, 3 }
  0x17   : > { %s612_s30 = sshll.u32 %s883_s16, 7  ;;  %p991_p0 = pnand %p636_p13, %p959_p4 }
  0x18   : > { %s200_s5 = sand.u32 1, %s887_s17   ;;  %s1189_s1 = sld [smem:[#allocation15_spill]] }
  0x19   : > { %s204_s9 = scalar_lea.vmem [#allocation5], %s595_s29  ;;  %p603_p1 = scmp.ge.s32.totalorder %s887_s17, 1 }
  0x1a   : > { %s213_s10 = sshll.u32 %s204_s9, 4  ;;  %p241_p2 = scmp.lt.s32.totalorder %s887_s17, 3  ;;  %s214_s10 = int_to_ptr.vmem [resolvable:$true] %s213_s10 }
  0x1b   : > { %s1005_s11 = scalar_lea.sflag [#allocation6], %s200_s5  ;;  %p721_p3 = pneg %p991_p0 }
  0x1c   : > { %s732_s19 = scalar_lea.vmem %s214_s10, 128  ;;  %s889_s21 = smov [#allocation5]  }
  0x1d   : > { %p733_p4 = scmp.ne.s32.totalorder %s214_s10, %s732_s19  ;;  %s737_s22 = sshll.u32 %s889_s21, 4  ;;  %s738_s22 = int_to_ptr.vmem [resolvable:$false] %s737_s22 }
  0x1e   : > { %s212_s8 = scalar_lea.hbm %s1189_s1, %s612_s30  ;;  %s739_s23 = scalar_lea.vmem %s738_s22, 256 }
  0x1f   : > { %p735_p5 = pnand %p733_p4, %p721_p3  ;;  %p740_p7 = scmp.lt.s32.totalorder %s214_s10, %s738_s22 }
  0x20   : > { %p741_p10 = scmp.lt.s32.totalorder %s739_s23, %s732_s19 }
  0x21   : > { %p736_p6 = pneg %p735_p5 }
  0x22   : > { %p742_p13 = por %p741_p10, %p740_p7 }
  0x24   : > { %p743_p12 = pnand %p742_p13, %p736_p6 }
  0x26   : > { %746 = shalt.err (!%p743_p12)
}
  0x27   : > { %s890_s6 = smov 32   ;;  %s891_s5 = smov 2  }
  0x28   : > { %628 = dma.hbm_to_vmem [thread:$0]  (!%p991_p0), %s212_s8, 128, %s214_s10, %s1005_s11, %s890_s6, %s890_s6, %s891_s5  }
  0x29   : > { %p1019_p4 = pnand %p603_p1, %p241_p2  ;;  %s189_s21 = scalar_lea.hbm %s1174_s0, %s612_s30 }
  0x2a   : > { %s181_s22 = scalar_lea.vmem [#allocation2], %s595_s29  ;;  %s601_s1 = sshll.u32 %s985_s28, 1 }
  0x2b   : > { %s190_s23 = sshll.u32 %s181_s22, 4  ;;  %s178_s20 = scalar_lea.sflag [#allocation3], %s985_s28  ;;  %s191_s23 = int_to_ptr.vmem [resolvable:$true] %s190_s23 }
  0x2c   : > { %s760_s26 = scalar_lea.vmem %s191_s23, 128  ;;  %s892_s8 = smov [#allocation2]  }
  0x2d   : > { %p761_p12 = scmp.ne.s32.totalorder %s191_s23, %s760_s26  ;;  %s765_s10 = sshll.u32 %s892_s8, 4  ;;  %s766_s10 = int_to_ptr.vmem [resolvable:$false] %s765_s10 }
  0x2e   : > { %s767_s14 = scalar_lea.vmem %s766_s10, 256  ;;  %p768_p2 = scmp.lt.s32.totalorder %s191_s23, %s766_s10 }
  0x2f   : > { %p763_p5 = pnand %p761_p12, %p721_p3  ;;  %p769_p6 = scmp.lt.s32.totalorder %s767_s14, %s760_s26 }
  0x31   : > { %p764_p1 = pneg %p763_p5  ;;  %p770_p7 = por %p769_p6, %p768_p2 }
  0x33   : > { %p771_p10 = pnand %p770_p7, %p764_p1 }
  0x35   : > { %774 = shalt.err (!%p771_p10)
}
  0x36   : > { %625 = dma.hbm_to_vmem [thread:$0]  (!%p991_p0), %s189_s21, 128, %s191_s23, %s178_s20, %s890_s6, %s890_s6, %s891_s5  }
  0x37   : > { %s602_s28 = sshll.u32 %s883_s16, 5  ;;  %s227_s29 = scalar_lea.vmem [#allocation7], %s601_s1 }
  0x38   : > { %s236_s30 = sshll.u32 %s227_s29, 4  ;;  %s234_s22 = scalar_lea.hbm %s1176_s2, %s602_s28  ;;  %s237_s30 = int_to_ptr.vmem [resolvable:$true] %s236_s30 }
  0x39   : > { %s788_s8 = scalar_lea.vmem %s237_s30, 32  ;;  %s893_s14 = smov [#allocation7]  }
  0x3a   : > { %p789_p13 = scmp.ne.s32.totalorder %s237_s30, %s788_s8  ;;  %s793_s26 = sshll.u32 %s893_s14, 4  ;;  %s794_s26 = int_to_ptr.vmem [resolvable:$false] %s793_s26 }
  0x3b   : > { %s795_s10 = scalar_lea.vmem %s794_s26, 64  ;;  %p796_p1 = scmp.lt.s32.totalorder %s237_s30, %s794_s26 }
  0x3c   : > { %p791_p12 = pnand %p789_p13, %p721_p3  ;;  %p797_p2 = scmp.lt.s32.totalorder %s795_s10, %s788_s8 }
  0x3e   : > { %p792_p5 = pneg %p791_p12  ;;  %p798_p6 = por %p797_p2, %p796_p1 }
  0x40   : > { %p799_p7 = pnand %p798_p6, %p792_p5 }
  0x42   : > { %802 = shalt.err (!%p799_p7)
}
  0x43   : > { %631 = dma.hbm_to_vmem [thread:$0]  (!%p991_p0), %s234_s22, 32, %s237_s30, %s1005_s11  }
  0x44   : > { %245 = sbr.rel (%p1019_p4) target bundleno = 162 (0xa2), region = 32  ;;  %s1050_s1 = sand.u32 (!%p1019_p4), 1, %s871_s13  }
  0x45   : > { %s604_s20 = sshll.u32 (!%p1019_p4), %s1050_s1, 3  ;;  %s248_s6 = scalar_lea.sflag (!%p1019_p4), [#allocation3], %s1050_s1 }
  0x46   : > { %s251_s5 = scalar_lea.vmem (!%p1019_p4), [#allocation2], %s604_s20 }
  0x49   : > { %854 = dma.done.wait (%p967_p8), %s248_s6, 128  }
  0x4a   : > { %856 = vsyncadd (%p967_p8), %s248_s6, 4294967168  ;;  %s256_s4 = sand.u32 1, %s947_s18   ;;  %s260_s7 = scalar_lea.vmem [#allocation5], %s604_s20 }
  0x4b   : > { %s257_s11 = scalar_lea.sflag [#allocation6], %s256_s4 }
  0x4c   : > { %858 = dma.done.wait (%p967_p8), %s257_s11, 160  }
  0x4d   : > { %860 = vsyncadd (%p967_p8), %s257_s11, 4294967136  ;;  %s606_s21 = sshll.u32 %s1050_s1, 1  ;;  %v894_v0 = vmov 0.0   ;;  %v1069_v1 = vld [vmem:[%s251_s5] sm:$0x3]  ;;  %vm320_vm0 = vcmask 1041408  }
  0x4e   : > { %s1066_s23 = scalar_lea.vmem [#allocation8], %s606_s21  ;;  %v1071_v2 = vld [vmem:[%s251_s5 + $0x2] sm:$0x3]  ;;  %v1073_v3 = vld [vmem:[%s251_s5 + $0x4] sm:$0x3]  ;;  %v321_v5 = vsel %vm320_vm0, %v1069_v1, -inf }
  0x4f   : > { %310 = vst [vmem:[%s1066_s23] sm:$0x3] %v894_v0  ;;  %v1075_v4 = vld [vmem:[%s251_s5 + $0x6] sm:$0x3]  ;;  %v322_v6 = vsel %vm320_vm0, %v1071_v2, -inf  ;;  %v323_v7 = vsel %vm320_vm0, %v1073_v3, -inf  ;;  %s269_s18 = scalar_lea.vmem [#allocation7], %s606_s21 }
  0x50   : > { %v324_v8 = vsel %vm320_vm0, %v1075_v4, -inf  ;;  %v315_v9 = vld [vmem:[%s260_s7] sm:$0x3]  ;;  %v325_v10 = vmax.f32 %v321_v5, %v322_v6  ;;  %v316_v12 = vld [vmem:[%s260_s7 + $0x2] sm:$0x3]  ;;  %s609_s24 = sshll.u32 %s879_s15, 5 }
  0x51   : > { %v326_v11 = vmax.f32 %v323_v7, %v324_v8  ;;  %v317_v13 = vld [vmem:[%s260_s7 + $0x4] sm:$0x3]  ;;  %v318_v14 = vld [vmem:[%s260_s7 + $0x6] sm:$0x3]  ;;  %v389_v16 = vsel %vm320_vm0, %v315_v9, -inf  ;;  %v390_v21 = vsel %vm320_vm0, %v316_v12, -inf  ;;  %s456_s9 = scalar_lea.hbm %s1177_s3, %s609_s24 }
  0x52   : > { %v391_v22 = vsel %vm320_vm0, %v317_v13, -inf  ;;  %v392_v23 = vsel %vm320_vm0, %v318_v14, -inf  ;;  %v393_v27 = vmax.f32 %v389_v16, %v390_v21  ;;  %s458_s28 = sshll.u32 %s1066_s23, 4  ;;  %s444_s19 = scalar_lea.sflag [#allocation4], %s1050_s1  ;;  %s459_s28 = int_to_ptr.vmem [resolvable:$true] %s458_s28 }
  0x53   : > { %v1085_v15 = vmax.f32 %v325_v10, %v326_v11  ;;  %v394_v33 = vmax.f32 %v391_v22, %v392_v23  ;;  %s803_s22 = scalar_lea.vmem %s459_s28, 32  ;;  %s895_s8 = smov [#allocation8]  }
  0x54   : > { %p804_p8 = scmp.ne.s32.totalorder %s459_s28, %s803_s22  ;;  %s807_s14 = sshll.u32 %s895_s8, 4  ;;  %s808_s14 = int_to_ptr.vmem [resolvable:$false] %s807_s14 }
  0x55   : > { %v328_v17 = vsub.f32 %v1069_v1, %v1085_v15  ;;  %v329_v18 = vsub.f32 %v1071_v2, %v1085_v15  ;;  %v330_v19 = vsub.f32 %v1073_v3, %v1085_v15  ;;  %v331_v20 = vsub.f32 %v1075_v4, %v1085_v15  ;;  %s809_s26 = scalar_lea.vmem %s808_s14, 64  ;;  %p810_p4 = scmp.lt.s32.totalorder %s459_s28, %s808_s14 }
  0x56   : > { %v395_v37 = vmax.f32 %v393_v27, %v394_v33  ;;  %p805_p0 = pnand %p804_p8, %p971_p9  ;;  %p811_p10 = scmp.lt.s32.totalorder %s809_s26, %s803_s22 }
  0x57   : > { %v332_v24 = vmul.f32 1.442695, %v328_v17  ;;  %v334_v25 = vmul.f32 1.442695, %v329_v18  ;;  %v336_v26 = vmul.f32 1.442695, %v330_v19 }
  0x58   : > { %v338_v28 = vmul.f32 1.442695, %v331_v20  ;;  %v367_v29 = vmul.f32 0.5, %v328_v17  ;;  %v368_v30 = vmul.f32 0.5, %v329_v18  ;;  %v369_v31 = vmul.f32 0.5, %v330_v19  ;;  %p806_p3 = pneg %p805_p0  ;;  %p812_p13 = por %p811_p10, %p810_p4 }
  0x59   : > { %689 = vpow2.f32 %v332_v24  ;;  %v370_v32 = vmul.f32 0.5, %v331_v20  ;;  %v396_v39 = vsub.f32 %v315_v9, %v395_v37  ;;  %v397_v40 = vsub.f32 %v316_v12, %v395_v37  ;;  %v319_v17 = vld [vmem:[%s269_s18] sm:$0x3] }
  0x5a   : > { %691 = vpow2.f32 %v334_v25  ;;  %v371_v34 = vmul.f32 1.442695, %v367_v29  ;;  %v373_v35 = vmul.f32 1.442695, %v368_v30  ;;  %v375_v36 = vmul.f32 1.442695, %v369_v31  ;;  %p813_p12 = pnand %p812_p13, %p806_p3 }
  0x5b   : > { %693 = vpow2.f32 %v336_v26  ;;  %v377_v38 = vmul.f32 1.442695, %v370_v32  ;;  %v398_v41 = vsub.f32 %v317_v13, %v395_v37  ;;  %v399_v42 = vsub.f32 %v318_v14, %v395_v37 }
  0x5c   : > { %695 = vpow2.f32 %v338_v28  ;;  %v400_v43 = vmul.f32 0.5, %v396_v39  ;;  %v401_v44 = vmul.f32 0.5, %v397_v40  ;;  %vm350_vm1 = vcmp.eq.s32.totalorder %v319_v17, 0 }
  0x5d   : > { %697 = vpow2.f32 %v371_v34  ;;  %v402_v45 = vmul.f32 0.5, %v398_v41  ;;  %v403_v46 = vmul.f32 0.5, %v399_v42  ;;  %vm351_vm2 = vcmp.eq.s32.totalorder %v319_v17, 1 }
  0x5e   : > { %699 = vpow2.f32 %v373_v35  ;;  %v404_v47 = vmul.f32 1.442695, %v400_v43  ;;  %v406_v48 = vmul.f32 1.442695, %v401_v44  ;;  %v354_v28 = vsel %vm350_vm1, %v1069_v1, 0.0 }
  0x5f   : > { %701 = vpow2.f32 %v375_v36  ;;  %v408_v49 = vmul.f32 1.442695, %v402_v45  ;;  %v410_v50 = vmul.f32 1.442695, %v403_v46  ;;  %v355_v29 = vsel %vm351_vm2, %v1071_v2, 0.0 }
  0x60   : > { %703 = vpow2.f32 %v377_v38  ;;  %vm352_vm3 = vcmp.eq.s32.totalorder %v319_v17, 2  ;;  %v358_v33 = vsel %vm320_vm0, %v354_v28, 0.0  ;;  %v359_v34 = vsel %vm320_vm0, %v355_v29, 0.0 }
  0x61   : > { %705 = vpow2.f32 %v404_v47  ;;  %v356_v35 = vsel %vm352_vm3, %v1073_v3, 0.0  ;;  %vm353_vm4 = vcmp.eq.s32.totalorder %v319_v17, 3  ;;  %v360_v37 = vadd.f32 %v359_v34, %v358_v33 }
  0x62   : > { %707 = vpow2.f32 %v406_v48  ;;  %v361_v38 = vsel %vm320_vm0, %v356_v35, 0.0  ;;  %v357_v40 = vsel %vm353_vm4, %v1075_v4, 0.0 }
  0x63   : > { %709 = vpow2.f32 %v408_v49  ;;  %v362_v42 = vadd.f32 %v361_v38, %v360_v37  ;;  %v363_v44 = vsel %vm320_vm0, %v357_v40, 0.0 }
  0x64   : > { %711 = vpow2.f32 %v410_v50  ;;  %v366_v50 = vmul.f32 0.5, %v1085_v15 }
  0x65   : > { %v364_v48 = vadd.f32 %v363_v44, %v362_v42 }
  0x66   : > { %v690_v51 = vpop.eup %689 }
  0x67   : > { %v692_v52 = vpop.eup %691  ;;  %v340_v53 = vsel %vm320_vm0, %v690_v51, 0.0 }
  0x68   : > { %v694_v54 = vpop.eup %693  ;;  %v341_v55 = vsel %vm320_vm0, %v692_v52, 0.0 }
  0x69   : > { %v696_v56 = vpop.eup %695  ;;  %v342_v57 = vadd.f32 %v341_v55, %v340_v53  ;;  %v343_v58 = vsel %vm320_vm0, %v694_v54, 0.0 }
  0x6a   : > { %v698_v59 = vpop.eup %697  ;;  %v345_v0 = vsel %vm320_vm0, %v696_v56, 0.0 }
  0x6b   : > { %v700_v60 = vpop.eup %699  ;;  %v344_v61 = vadd.f32 %v343_v58, %v342_v57  ;;  %v379_v62 = vsel %vm320_vm0, %v698_v59, 0.0 }
  0x6c   : > { %v702_v63 = vpop.eup %701  ;;  %v380_v5 = vsel %vm320_vm0, %v700_v60, 0.0 }
  0x6d   : > { %v704_v6 = vpop.eup %703  ;;  %v381_v7 = vadd.f32 %v380_v5, %v379_v62  ;;  %v382_v8 = vsel %vm320_vm0, %v702_v63, 0.0  ;;  %v346_v9 = vadd.f32 %v345_v0, %v344_v61  ;;  %v440_v61 = vld [vmem:[%s1066_s23] sm:$0x3] }
  0x6e   : > { %v706_v11 = vpop.eup %705  ;;  %v384_v12 = vsel %vm320_vm0, %v704_v6, 0.0 }
  0x6f   : > { %v383_v10 = vadd.f32 %v382_v8, %v381_v7  ;;  %v708_v13 = vpop.eup %707  ;;  %v412_v14 = vsel %vm320_vm0, %v706_v11, 0.0  ;;  %713 = vlog2.f32 %v346_v9  ;;  %v419_v25 = vmul.f32 %v706_v11, %v1069_v1 }
  0x70   : > { %v710_v16 = vpop.eup %709  ;;  %v413_v18 = vsel %vm320_vm0, %v708_v13, 0.0  ;;  %v420_v26 = vmul.f32 %v708_v13, %v1071_v2 }
  0x71   : > { %v712_v19 = vpop.eup %711  ;;  %v385_v20 = vadd.f32 %v384_v12, %v383_v10  ;;  %v414_v21 = vadd.f32 %v413_v18, %v412_v14  ;;  %v415_v22 = vsel %vm320_vm0, %v710_v16, 0.0  ;;  %v421_v30 = vmul.f32 %v710_v16, %v1073_v3 }
  0x72   : > { %v417_v23 = vsel %vm320_vm0, %v712_v19, 0.0  ;;  %v423_v31 = vsel %vm320_vm0, %v419_v25, 0.0  ;;  %v424_v32 = vsel %vm320_vm0, %v420_v26, 0.0  ;;  %v422_v1 = vmul.f32 %v712_v19, %v1075_v4 }
  0x73   : > { %v416_v24 = vadd.f32 %v415_v22, %v414_v21  ;;  %715 = vlog2.f32 %v385_v20  ;;  %v425_v36 = vadd.f32 %v424_v32, %v423_v31  ;;  %v426_v2 = vsel %vm320_vm0, %v421_v30, 0.0 }
  0x74   : > { %v428_v43 = vsel %vm320_vm0, %v422_v1, 0.0 }
  0x75   : > { %v418_v27 = vadd.f32 %v417_v23, %v416_v24  ;;  %v427_v41 = vadd.f32 %v426_v2, %v425_v36 }
  0x77   : > { %717 = vrcp.f32 %v418_v27  ;;  %v429_v46 = vadd.f32 %v428_v43, %v427_v41 }
  0x79   : > { %v434_v53 = vmul.f32 0.5, %v429_v46 }
  0x7c   : > { %v714_v39 = vpop.eup %713 }
  0x7d   : > { %v348_v45 = vmul.f32 0.6931472, %v714_v39 }
  0x7f   : > { %v349_v49 = vadd.f32 %v348_v45, %v1085_v15 }
  0x80   : > { %v716_v3 = vpop.eup %715 }
  0x81   : > { %v387_v51 = vmul.f32 0.6931472, %v716_v3  ;;  %v365_v54 = vsub.f32 %v349_v49, %v364_v48 }
  0x83   : > { %v388_v55 = vadd.f32 %v387_v51, %v366_v50  ;;  %v437_v59 = vmul.f32 0.3, %v365_v54 }
  0x84   : > { %v718_v47 = vpop.eup %717 }
  0x85   : > { %v431_v4 = vmul.f32 %v718_v47, %v418_v27 }
  0x87   : > { %v432_v52 = vsub.f32 2.0, %v431_v4 }
  0x89   : > { %v433_v56 = vmul.f32 %v718_v47, %v432_v52 }
  0x8b   : > { %v435_v57 = vmul.f32 %v434_v53, %v433_v56 }
  0x8d   : > { %v436_v58 = vsub.f32 %v388_v55, %v435_v57 }
  0x8f   : > { %v438_v60 = vmul.f32 2.8, %v436_v58 }
  0x91   : > { %v439_v62 = vadd.f32 %v438_v60, %v437_v59 }
  0x93   : > { %v441_v63 = vadd.f32 %v440_v61, %v439_v62 }
  0x95   : > { %442 = vst [vmem:[%s1066_s23] sm:$0x3] %v441_v63 }
  0x96   : > { %816 = shalt.err (!%p813_p12)
}
  0x97   : > { %s817_s15 = scalar_lea.hbm %s456_s9, 32  ;;  %s821_s20 = scalar_lea.hbm %s1177_s3, 64 }
  0x98   : > { %p818_p5 = scmp.ne.s32.totalorder %s456_s9, %s817_s15  ;;  %p822_p6 = scmp.lt.s32.totalorder %s456_s9, %s1177_s3 }
  0x99   : > { %p823_p7 = scmp.lt.s32.totalorder %s821_s20, %s817_s15 }
  0x9a   : > { %p819_p1 = pnand %p818_p5, %p971_p9 }
  0x9b   : > { %p824_p8 = por %p823_p7, %p822_p6 }
  0x9c   : > { %p820_p2 = pneg %p819_p1 }
  0x9e   : > { %p825_p0 = pnand %p824_p8, %p820_p2 }
  0xa0   : > { %828 = shalt.err (!%p825_p0)
}
  0xa1   : > { %620 = dma.vmem_to_hbm [thread:$0]  (%p971_p9), %s459_s28, 32, %s456_s9, %s444_s19  }
  0xa2 PF: > { %s470_s4 = sand.u32 1, %s867_s12   ;;  %p1191_p3 = scmp.ge.s32.totalorder %s887_s17, 2 }
  0xa3   : > { %s471_s11 = scalar_lea.sflag [#allocation4], %s470_s4 }
  0xa4   : > { %p633_p4 = pnand %p1191_p3, %p978_p11 }
  0xa6   : > { %p634_p10 = pneg %p633_p4 }
  0xa8   : > { %862 = dma.done.wait (%p634_p10), %s471_s11, 32  }
  0xa9   : > { %864 = vsyncadd (%p634_p10), %s471_s11, 4294967264  ;;  %s22_s17 = sadd.s32 1, %s887_s17   ;;  %s1192_s7 = sld [smem:[#allocation12_spill]] }
  0xaa   : > { %p19_p13 = scmp.ge.s32.totalorder %s22_s17, 4   ;;  %s1193_s14 = sld [smem:[#allocation14_spill]] }
  0xab   : > { %s1194_s25 = sld [smem:[#allocation13_spill]]  ;;  %s1195_s12 = smov %s871_s13 }
  0xac   : > { %s1197_s15 = smov %s883_s16 }
  0xad   :  { %21 = sbr.rel (!%p19_p13) target bundleno = 10 (0xa), region = 105 }
  0xaf   : > { %s1196_s13 = smov %s1192_s7 }
  0xb1   : > { %s1198_s16 = smov %s1194_s25 }
  0xb2   :  { %476 = vsyncpa [#allocation3], 1 }
  0xb3   :  { %478 = vsyncpa [#allocation3 + $0x1], 1 }
  0xb4   :  { %479 = vsyncpa [#allocation6], 1 }
  0xb5   :  { %481 = vsyncpa [#allocation6 + $0x1], 1 }
  0xb6   :  { %482 = vsyncpa [#allocation4], 1 }
  0xb7   :  { %484 = vsyncpa [#allocation4 + $0x1], 1 }

</bundles_post_ra>
